<compile_context>
chip_gen: v7x
topology: tpu7x:2x2x1
jax: 0.10.0
libtpu: 0.0.40
codegen_flags: <defaults>
</compile_context>

<pallas_src>
import jax
import jax.numpy as jnp
from jax.experimental import pallas as pl
from jax.experimental.pallas import tpu as pltpu


# ---------------------------------------------------------------------------
# pe table construction (glue, not hot path)
# ---------------------------------------------------------------------------
def _build_pe(d_model: int, max_len: int, dtype=jnp.float32) -> jnp.ndarray:
    """Sinusoidal table, shape (max_len, d_model). Handles odd d_model too."""
    position = jnp.arange(max_len, dtype=jnp.float32)[:, None]            # (L, 1)
    div_term = jnp.exp(jnp.arange(0, d_model, 2, dtype=jnp.float32)
                       * (-jnp.log(10000.0) / d_model))                   # (ceil(D/2),)
    angles = position * div_term                                          # (L, ceil(D/2))
    pe = jnp.zeros((max_len, d_model), jnp.float32)
    pe = pe.at[:, 0::2].set(jnp.sin(angles))
    pe = pe.at[:, 1::2].set(jnp.cos(angles)[:, : d_model // 2])
    return pe.astype(dtype)                                               # (L, D)


# ---------------------------------------------------------------------------
# kernel: broadcast add of the positional table onto the activations
# ---------------------------------------------------------------------------
def _pe_add_kernel(x_ref, pe_ref, o_ref):
    # 3-D path: x (TS,B,D) + pe (TS,1,D)  -> sublane broadcast on the VPU.
    # 2-D path: x (TS,B*D) + pe (TS,B*D)  -> plain elementwise add.
    o_ref[...] = (x_ref[...] + pe_ref[...]).astype(o_ref.dtype)


# ---------------------------------------------------------------------------
# tiling helper: pick the largest seq tile under a per-step VMEM byte budget
# ---------------------------------------------------------------------------
def _choose_tile_s(S: int, bytes_per_row: int, target_bytes: int) -> int:
    ts = max(1, target_bytes // max(bytes_per_row, 1))
    if ts >= S:
        return S
    ts = max(8, (ts // 8) * 8)   # keep second-to-last block dim 8-aligned
    return min(ts, S)


# Per grid-step working set (x-in + pe + out, single buffer).  Double-buffered
# by the pipeline -> ~2x this, which stays under the default scoped-VMEM limit
# on every generation (v7x: 32 MiB scoped / 64 MiB physical) while being large
# enough to amortize the ~0.35 us per-step overhead on v5e/v6e.
_TILE_BYTES = 8 * 1024 * 1024
_MIN_PALLAS_BYTES = 1 << 20   # below this, XLA's fused add beats kernel overhead


def _pe_add_3d(x, pe2d, tile_bytes):
    """D multiple of 128: already lane-dense; pe traffic stays minimal (S*D)."""
    S, B, D = x.shape
    itemsize = x.dtype.itemsize
    bytes_per_row = (2 * B * D + D) * itemsize            # x in + out + pe row
    TS = _choose_tile_s(S, bytes_per_row, tile_bytes)
    pe3d = pe2d[:, None, :]                               # (S, 1, D)
    return pl.pallas_call(
        _pe_add_kernel,
        out_shape=jax.ShapeDtypeStruct((S, B, D), x.dtype),
        grid=(pl.cdiv(S, TS),),
        in_specs=[
            pl.BlockSpec((TS, B, D), lambda s: (s, 0, 0)),
            pl.BlockSpec((TS, 1, D), lambda s: (s, 0, 0)),
        ],
        out_specs=pl.BlockSpec((TS, B, D), lambda s: (s, 0, 0)),
        compiler_params=pltpu.CompilerParams(dimension_semantics=("parallel",)),
    )(x, pe3d)


def _pe_add_2d_flat(x, pe2d, tile_bytes):
    """D not a multiple of 128: flatten (B, D) -> B*D for lane-denser stores."""
    S, B, D = x.shape
    itemsize = x.dtype.itemsize
    xf = x.reshape(S, B * D)                              # free: row-major contiguous
    pef = jnp.tile(pe2d, (1, B))                          # (S, B*D), built once by XLA
    bytes_per_row = 3 * B * D * itemsize
    TS = _choose_tile_s(S, bytes_per_row, tile_bytes)
    out = pl.pallas_call(
        _pe_add_kernel,
        out_shape=jax.ShapeDtypeStruct((S, B * D), x.dtype),
        grid=(pl.cdiv(S, TS),),
        in_specs=[
            pl.BlockSpec((TS, B * D), lambda s: (s, 0)),
            pl.BlockSpec((TS, B * D), lambda s: (s, 0)),
        ],
        out_specs=pl.BlockSpec((TS, B * D), lambda s: (s, 0)),
        compiler_params=pltpu.CompilerParams(dimension_semantics=("parallel",)),
    )(xf, pef)
    return out.reshape(S, B, D)


def positional_encoding_forward(x: jnp.ndarray, pe: jnp.ndarray, *,
                                force_pallas: bool = False,
                                tile_bytes: int = _TILE_BYTES) -> jnp.ndarray:
    """x: (S, B, D); pe: (max_len, D) (or (max_len, 1, D)). Returns x + pe[:S]."""
    S, B, D = x.shape
    if pe.ndim == 3:                                      # accept PyTorch-style buffer
        pe = pe[:, 0, :]
    pe_slice = pe[:S].astype(x.dtype)                     # cast once in the wrapper

    # Tiny inputs: custom-call + DMA setup overhead dwarfs a few-KiB add.
    if not force_pallas and x.size * x.dtype.itemsize < _MIN_PALLAS_BYTES:
        return x + pe_slice[:, None, :]

    if D % 128 == 0:
        return _pe_add_3d(x, pe_slice, tile_bytes)
    return _pe_add_2d_flat(x, pe_slice, tile_bytes)


# ---------------------------------------------------------------------------
# demo / correctness check
# ---------------------------------------------------------------------------
if __name__ == "__main__":
    key = jax.random.PRNGKey(0)

    # Case 1: matches the PyTorch module's toy config (d_model=32 -> flat path).
    d_model, max_len, seq_len, batch = 32, 64, 8, 2
    x = jax.random.normal(key, (seq_len, batch, d_model), dtype=jnp.float32)
    pe = _build_pe(d_model, max_len)
    out = positional_encoding_forward(x, pe, force_pallas=True)
    out = jax.block_until_ready(out)
    ref = x + pe[:seq_len][:, None, :]
    assert out.shape == (seq_len, batch, d_model)
    assert jnp.allclose(out, ref, atol=1e-6), "mismatch vs reference (flat path)"

    # Case 2: lane-dense d_model (multiple of 128) exercises the 3-D broadcast path.
    d2, s2, b2 = 128, 16, 4
    key2 = jax.random.PRNGKey(0)
    x2 = jax.random.normal(key2, (s2, b2, d2), dtype=jnp.float32)
    pe2 = _build_pe(d2, 64)
    out2 = jax.block_until_ready(positional_encoding_forward(x2, pe2, force_pallas=True))
    ref2 = x2 + pe2[:s2][:, None, :]
    assert jnp.allclose(out2, ref2, atol=1e-6), "mismatch vs reference (3d path)"

    # Case 3: bf16 activations — pe is pre-cast in the wrapper, store dtype explicit.
    xb = x2.astype(jnp.bfloat16)
    outb = jax.block_until_ready(positional_encoding_forward(xb, pe2, force_pallas=True))
    refb = xb + pe2[:s2][:, None, :].astype(jnp.bfloat16)
    assert jnp.allclose(outb.astype(jnp.float32), refb.astype(jnp.float32), atol=1e-2), \
        "mismatch vs reference (bf16 path)"

    print("KERNEL_OK")
</pallas_src>

<mosaic_0001>
module attributes {stable_mosaic.version = 11 : i64} {
  func.func @_pe_add_kernel(%arg0: i32, %arg1: memref<8x64xf32, #tpu.memory_space<vmem>>, %arg2: memref<8x64xf32, #tpu.memory_space<vmem>>, %arg3: memref<8x64xf32, #tpu.memory_space<vmem>>) attributes {dimension_semantics = [#tpu.dimension_semantics<parallel>], iteration_bounds = array<i64: 1>, scalar_prefetch = 0 : i64, scratch_operands = 0 : i64, tpu.core_type = #tpu.core_type<tc>, window_params = [{transform_indices = @transform_0, window_bounds = array<i64: 8, 64>}, {transform_indices = @transform_1, window_bounds = array<i64: 8, 64>}, {transform_indices = @transform_2, window_bounds = array<i64: 8, 64>}]} {
    %c0 = arith.constant 0 : index
    %c0_0 = arith.constant 0 : index
    %0 = vector.load %arg1[%c0, %c0_0] : memref<8x64xf32, #tpu.memory_space<vmem>>, vector<8x64xf32>
    %c0_1 = arith.constant 0 : index
    %c0_2 = arith.constant 0 : index
    %1 = vector.load %arg2[%c0_1, %c0_2] : memref<8x64xf32, #tpu.memory_space<vmem>>, vector<8x64xf32>
    %2 = arith.addf %0, %1 : vector<8x64xf32>
    %c0_3 = arith.constant 0 : index
    %c0_4 = arith.constant 0 : index
    %3 = vector.load %arg3[%c0_3, %c0_4] : memref<8x64xf32, #tpu.memory_space<vmem>>, vector<8x64xf32>
    tpu.vector_store %arg3[%c0_3, %c0_4], %2 {strides = array<i32>} : memref<8x64xf32, #tpu.memory_space<vmem>>, vector<8x64xf32>,
    return
  }
  func.func @transform_0(%arg0: i32) -> (i32, i32) {
    %c0_i32 = arith.constant 0 : i32
    %c0_i32_0 = arith.constant 0 : i32
    return %arg0, %c0_i32 : i32, i32
  }
  func.func @transform_1(%arg0: i32) -> (i32, i32) {
    %c0_i32 = arith.constant 0 : i32
    %c0_i32_0 = arith.constant 0 : i32
    return %arg0, %c0_i32 : i32, i32
  }
  func.func @transform_2(%arg0: i32) -> (i32, i32) {
    %c0_i32 = arith.constant 0 : i32
    %c0_i32_0 = arith.constant 0 : i32
    return %arg0, %c0_i32 : i32, i32
  }
}

</mosaic_0001>

<bundles_post_ra>
// kernel: tpu_custom_call.1
= control target key start
LH: loop header
LB: loop body
LE: loop exit
PB: predicated region body
PF: predicated region fallthrough
CT: control target
= control target key end

     0   :  { %7 = vsyncpa [#allocation3], 0  ;;  %s186_s0 = inlined_call_operand.hbm [shape: f32[8,64], index: 0, kind: input, shape index: {}]   ;;  %s187_s1 = inlined_call_operand.hbm [shape: f32[8,64], index: 1, kind: input, shape index: {}]   ;;  %s188_s2 = inlined_call_operand.hbm [shape: f32[8,64], index: 2, kind: output, shape index: {}]  }
   0x1   :  { %8 = vsyncpa [#allocation6], 0 }
   0x2   :  { %9 = vsyncpa [#allocation4], 0  ;;  %s132_s9 = smov [#allocation2]   ;;  %s133_s11 = smov [#allocation5]  }
   0x3   :  { %s16_s10 = sshll.u32 %s132_s9, 4  ;;  %s26_s12 = sshll.u32 %s133_s11, 4  ;;  %s17_s10 = int_to_ptr.vmem [resolvable:$true] %s16_s10  ;;  %s27_s12 = int_to_ptr.vmem [resolvable:$true] %s26_s12 }
   0x4   :  { %s60_s15 = scalar_lea.hbm %s186_s0, 128 }
   0x5   :  { %p61_p0 = scmp.ne.s32.totalorder %s186_s0, %s60_s15  ;;  %p64_p1 = scmp.lt.u32.totalorder %s60_s15, %s186_s0 }
   0x7   :  { %p66_p2 = pnand %p64_p1, %p61_p0 }
   0x9   :  { %69 = shalt.err (!%p66_p2)
}
   0xa   :  { %s70_s20 = scalar_lea.vmem %s17_s10, 128  ;;  %p75_p4 = scmp.lt.s32.totalorder %s17_s10, %s17_s10 }
   0xb   :  { %p71_p3 = scmp.ne.s32.totalorder %s17_s10, %s70_s20  ;;  %p76_p5 = scmp.lt.s32.totalorder %s70_s20, %s70_s20 }
   0xd   :  { %p77_p6 = por %p76_p5, %p75_p4 }
   0xf   :  { %p78_p7 = pnand %p77_p6, %p71_p3 }
  0x11   :  { %81 = shalt.err (!%p78_p7)
}
  0x12   :  { %19 = dma.hbm_to_vmem [thread:$0]  %s186_s0, 128, %s17_s10, [#allocation3]  }
  0x13   :  { %s82_s25 = scalar_lea.hbm %s187_s1, 128 }
  0x14   :  { %p83_p8 = scmp.ne.s32.totalorder %s187_s1, %s82_s25  ;;  %p86_p9 = scmp.lt.u32.totalorder %s82_s25, %s187_s1 }
  0x16   :  { %p88_p10 = pnand %p86_p9, %p83_p8 }
  0x18   :  { %91 = shalt.err (!%p88_p10)
}
  0x19   :  { %s92_s30 = scalar_lea.vmem %s27_s12, 128  ;;  %p97_p12 = scmp.lt.s32.totalorder %s27_s12, %s27_s12 }
  0x1a   :  { %p93_p11 = scmp.ne.s32.totalorder %s27_s12, %s92_s30  ;;  %p98_p13 = scmp.lt.s32.totalorder %s92_s30, %s92_s30 }
  0x1c   :  { %p99_p0 = por %p98_p13, %p97_p12 }
  0x1e   :  { %p100_p1 = pnand %p99_p0, %p93_p11 }
  0x20   :  { %103 = shalt.err (!%p100_p1)
}
  0x21   :  { %29 = dma.hbm_to_vmem [thread:$0]  %s187_s1, 128, %s27_s12, [#allocation6]  }
  0x22   :  { %126 = dma.done.wait [#allocation3], 128  }
  0x23   :  { %127 = vsyncadd [#allocation3], 4294967168 }
  0x24   :  { %128 = dma.done.wait [#allocation6], 128  }
  0x25   :  { %129 = vsyncadd [#allocation6], 4294967168  ;;  %s134_s4 = smov [#allocation7]   ;;  %v36_v0 = vld [vmem:[#allocation2] sm:$0xff]  ;;  %v37_v1 = vld [vmem:[#allocation5] sm:$0xff]  ;;  %vm39_vm0 = vcmask 523264  }
  0x26   :  { %s47_s5 = sshll.u32 %s134_s4, 4  ;;  %v38_v2 = vadd.f32 %v37_v1, %v36_v0  ;;  %s48_s5 = int_to_ptr.vmem [resolvable:$true] %s47_s5 }
  0x27   :  { %s104_s6 = scalar_lea.vmem %s48_s5, 128  ;;  %p109_p3 = scmp.lt.s32.totalorder %s48_s5, %s48_s5 }
  0x28   :  { %40 = vst.msk [vmem:[#allocation7] sm:$0xff] %vm39_vm0, %v38_v2  ;;  %p105_p2 = scmp.ne.s32.totalorder %s48_s5, %s104_s6  ;;  %p110_p4 = scmp.lt.s32.totalorder %s104_s6, %s104_s6 }
  0x2a   :  { %p111_p5 = por %p110_p4, %p109_p3 }
  0x2c   :  { %p112_p6 = pnand %p111_p5, %p105_p2 }
  0x2e   :  { %115 = shalt.err (!%p112_p6)
}
  0x2f   :  { %s116_s8 = scalar_lea.hbm %s188_s2, 128 }
  0x30   :  { %p117_p7 = scmp.ne.s32.totalorder %s188_s2, %s116_s8  ;;  %p120_p8 = scmp.lt.u32.totalorder %s116_s8, %s188_s2 }
  0x32   :  { %p122_p9 = pnand %p120_p8, %p117_p7 }
  0x34   :  { %125 = shalt.err (!%p122_p9)
}
  0x35   :  { %50 = dma.vmem_to_hbm [thread:$0]  %s48_s5, 128, %s188_s2, [#allocation4]  }
  0x36   :  { %130 = dma.done.wait [#allocation4], 128  }
  0x37   :  { %131 = vsyncadd [#allocation4], 4294967168 }
  0x38   :  { %54 = vsyncpa [#allocation3], 1 }
  0x39   :  { %55 = vsyncpa [#allocation6], 1 }
  0x3a   :  { %56 = vsyncpa [#allocation4], 1 }

</bundles_post_ra>
